<compile_context>
chip_gen: v6e
topology: v6e:2x2x1
jax: 0.10.0
libtpu: 0.0.40
codegen_flags: <defaults>
</compile_context>

<pallas_src>
import functools

import jax
import jax.numpy as jnp
from jax.experimental import pallas as pl
from jax.experimental.pallas import tpu as pltpu


_BATCH_TILE = 512  # rows per grid step once B is large; multiple of 8 sublanes


# --------------------------------------------------------------------------- kernel
def _qnet_kernel(s_ref, a_ref, w1s_ref, w1a_ref, w2_ref, w3_ref, b_ref, q_ref):
    """Fused twin-Q forward for one batch tile.

    s_ref:  [TB, num_inputs]  f32
    a_ref:  [TB, num_actions] f32
    w1s_ref:[num_inputs, 2H]  (bf16 or f32)   -- rows of [W1|W4] for `state`
    w1a_ref:[num_actions, 2H]                 -- rows of [W1|W4] for `action`
    w2_ref: [2H, 2H]  block-diag(W2, W5)
    w3_ref: [2H, 2]   [[W3, 0], [0, W6]]
    b_ref:  [3, 2H]   f32  (row0 = [b1|b4], row1 = [b2|b5], row2 = [b3, b6, 0...])
    q_ref:  [TB, 2]   f32  (col0 = q1, col1 = q2)
    """
    w1s = w1s_ref[...]
    w1a = w1a_ref[...]
    w2 = w2_ref[...]
    w3 = w3_ref[...]
    mxu_dtype = w1s.dtype

    s = s_ref[...].astype(mxu_dtype)
    a = a_ref[...].astype(mxu_dtype)

    # Layer 1 (both heads): xu @ [W1|W4] == state @ W1s + action @ W1a.
    h = (jnp.dot(s, w1s, preferred_element_type=jnp.float32)
         + jnp.dot(a, w1a, preferred_element_type=jnp.float32)
         + b_ref[0:1, :])
    h = jnp.maximum(h, 0.0)

    # Layer 2 (both heads), block-diagonal fused weight.
    h = jnp.dot(h.astype(mxu_dtype), w2,
                preferred_element_type=jnp.float32) + b_ref[1:2, :]
    h = jnp.maximum(h, 0.0)

    # Layer 3: [2H, 2] -> q1 in lane 0, q2 in lane 1.
    b3_row = b_ref[2:3, :]
    q = jnp.dot(h.astype(mxu_dtype), w3,
                preferred_element_type=jnp.float32) + b3_row[:, 0:2]
    q_ref[...] = q


# --------------------------------------------------------------------------- wrapper
def _round_up(x, m):
    return (x + m - 1) // m * m


@jax.jit
def qnetwork_forward(state, action, fused_params):
    """state: [B, num_inputs], action: [B, num_actions] -> (q1 [B, 1], q2 [B, 1])."""
    state = state.astype(jnp.float32)
    action = action.astype(jnp.float32)

    B, num_inputs = state.shape
    num_actions = action.shape[1]

    w1s = fused_params["w1s"]
    w1a = fused_params["w1a"]
    w2 = fused_params["w2"]
    w3 = fused_params["w3"]
    biases = fused_params["biases"]

    # Pick a batch tile: whole (8-padded) batch if small, else _BATCH_TILE chunks.
    b8 = _round_up(B, 8)
    if b8 <= _BATCH_TILE:
        tb, b_pad = b8, b8
    else:
        tb = _BATCH_TILE
        b_pad = _round_up(B, tb)

    if b_pad != B:
        pad = b_pad - B
        state = jnp.pad(state, ((0, pad), (0, 0)))
        action = jnp.pad(action, ((0, pad), (0, 0)))

    grid = (b_pad // tb,)

    batch_spec = lambda shape: pl.BlockSpec(shape, lambda i: (i, 0))
    resident_spec = lambda arr: pl.BlockSpec(arr.shape, lambda i: (0, 0))

    q = pl.pallas_call(
        _qnet_kernel,
        out_shape=jax.ShapeDtypeStruct((b_pad, 2), jnp.float32),
        grid=grid,
        in_specs=[
            batch_spec((tb, num_inputs)),       # state
            batch_spec((tb, num_actions)),      # action
            resident_spec(w1s),                 # fused layer-1 weight (state rows)
            resident_spec(w1a),                 # fused layer-1 weight (action rows)
            resident_spec(w2),                  # block-diag layer-2 weight
            resident_spec(w3),                  # fused layer-3 weight
            resident_spec(biases),              # packed bias slab
        ],
        out_specs=pl.BlockSpec((tb, 2), lambda i: (i, 0)),
        compiler_params=pltpu.CompilerParams(
            dimension_semantics=("parallel",)),
    )(state, action, w1s, w1a, w2, w3, biases)

    q = q[:B]
    return q[:, 0:1], q[:, 1:2]


# --------------------------------------------------------------------------- params
def _xavier_uniform(key, fan_in, fan_out, gain=1.0):
    limit = gain * jnp.sqrt(6.0 / (fan_in + fan_out))
    # Stored as [in, out] (transpose of PyTorch's [out, in]); same init law.
    return jax.random.uniform(key, (fan_in, fan_out), jnp.float32, -limit, limit)


def init_qnetwork_params(key, num_inputs, num_actions, hidden_dim):
    """Per-layer params matching the PyTorch module (xavier_uniform W, zero b)."""
    d_in = num_inputs + num_actions
    keys = jax.random.split(key, 6)
    return {
        "w1": _xavier_uniform(keys[0], d_in, hidden_dim),
        "b1": jnp.zeros((1, hidden_dim), jnp.float32),
        "w2": _xavier_uniform(keys[1], hidden_dim, hidden_dim),
        "b2": jnp.zeros((1, hidden_dim), jnp.float32),
        "w3": _xavier_uniform(keys[2], hidden_dim, 1),
        "b3": jnp.zeros((1, 1), jnp.float32),
        "w4": _xavier_uniform(keys[3], d_in, hidden_dim),
        "b4": jnp.zeros((1, hidden_dim), jnp.float32),
        "w5": _xavier_uniform(keys[4], hidden_dim, hidden_dim),
        "b5": jnp.zeros((1, hidden_dim), jnp.float32),
        "w6": _xavier_uniform(keys[5], hidden_dim, 1),
        "b6": jnp.zeros((1, 1), jnp.float32),
    }


def pack_qnetwork_params(p, num_inputs, weight_dtype=jnp.bfloat16):
    """Fuse the six Linear layers into the packed slabs the kernel expects."""
    hidden = p["w1"].shape[1]
    f32 = jnp.float32

    w1f = jnp.concatenate([p["w1"], p["w4"]], axis=1)           # [d_in, 2H]
    w1s = w1f[:num_inputs]                                      # [num_inputs, 2H]
    w1a = w1f[num_inputs:]                                      # [num_actions, 2H]

    z_hh = jnp.zeros((hidden, hidden), f32)
    w2f = jnp.block([[p["w2"], z_hh], [z_hh, p["w5"]]])         # [2H, 2H]

    z_h1 = jnp.zeros((hidden, 1), f32)
    w3f = jnp.concatenate(
        [jnp.concatenate([p["w3"], z_h1], axis=1),
         jnp.concatenate([z_h1, p["w6"]], axis=1)], axis=0)     # [2H, 2]

    b1f = jnp.concatenate([p["b1"], p["b4"]], axis=1)           # [1, 2H]
    b2f = jnp.concatenate([p["b2"], p["b5"]], axis=1)           # [1, 2H]
    b3f = (jnp.zeros((1, 2 * hidden), f32)
           .at[0, 0].set(p["b3"][0, 0])
           .at[0, 1].set(p["b6"][0, 0]))                        # [1, 2H]
    biases = jnp.concatenate([b1f, b2f, b3f], axis=0)           # [3, 2H]

    return {
        "w1s": w1s.astype(weight_dtype),
        "w1a": w1a.astype(weight_dtype),
        "w2": w2f.astype(weight_dtype),
        "w3": w3f.astype(weight_dtype),
        "biases": biases.astype(f32),   # bias add / ReLU stay f32 on all chips
    }


# --------------------------------------------------------------------------- refs
def _reference_forward(state, action, p):
    """Pure-f32 JAX reference (exact PyTorch semantics)."""
    xu = jnp.concatenate([state, action], axis=1)
    h1 = jax.nn.relu(xu @ p["w1"] + p["b1"])
    h1 = jax.nn.relu(h1 @ p["w2"] + p["b2"])
    q1 = h1 @ p["w3"] + p["b3"]
    h2 = jax.nn.relu(xu @ p["w4"] + p["b4"])
    h2 = jax.nn.relu(h2 @ p["w5"] + p["b5"])
    q2 = h2 @ p["w6"] + p["b6"]
    return q1, q2


def _reference_forward_cast(state, action, p, dtype):
    """Reference with the same bf16 MXU-operand cast / f32 accumulation as the kernel."""
    def lin(x, w, b):
        return jnp.dot(x.astype(dtype), w.astype(dtype),
                       preferred_element_type=jnp.float32) + b
    xu = jnp.concatenate([state, action], axis=1)
    h1 = jax.nn.relu(lin(xu, p["w1"], p["b1"]))
    h1 = jax.nn.relu(lin(h1, p["w2"], p["b2"]))
    q1 = lin(h1, p["w3"], p["b3"])
    h2 = jax.nn.relu(lin(xu, p["w4"], p["b4"]))
    h2 = jax.nn.relu(lin(h2, p["w5"], p["b5"]))
    q2 = lin(h2, p["w6"], p["b6"])
    return q1, q2


# --------------------------------------------------------------------------- main
if __name__ == "__main__":
    num_inputs, num_actions, hidden_dim, batch = 24, 8, 32, 8

    key = jax.random.PRNGKey(0)
    k_param, k_state, k_action = jax.random.split(key, 3)

    layer_params = init_qnetwork_params(k_param, num_inputs, num_actions, hidden_dim)
    fused_params = pack_qnetwork_params(layer_params, num_inputs,
                                        weight_dtype=jnp.bfloat16)

    state = jax.random.normal(k_state, (batch, num_inputs), jnp.float32)
    action = jax.random.normal(k_action, (batch, num_actions), jnp.float32)

    q1, q2 = qnetwork_forward(state, action, fused_params)
    jax.block_until_ready((q1, q2))

    assert q1.shape == (batch, 1) and q2.shape == (batch, 1)

    # Tight check against a reference that mirrors the bf16 MXU-operand cast.
    r1c, r2c = _reference_forward_cast(state, action, layer_params, jnp.bfloat16)
    assert jnp.allclose(q1, r1c, atol=1e-4, rtol=1e-4), "mismatch vs cast-matched ref"
    assert jnp.allclose(q2, r2c, atol=1e-4, rtol=1e-4), "mismatch vs cast-matched ref"

    # Loose semantic check against the pure-f32 PyTorch-equivalent reference.
    r1, r2 = _reference_forward(state, action, layer_params)
    assert jnp.allclose(q1, r1, atol=5e-2, rtol=5e-2), "drifted from f32 semantics"
    assert jnp.allclose(q2, r2, atol=5e-2, rtol=5e-2), "drifted from f32 semantics"

    print("KERNEL_OK")
</pallas_src>

<mosaic_0001>
module attributes {stable_mosaic.version = 11 : i64} {
  func.func @_qnet_kernel(%arg0: i32, %arg1: memref<8x24xf32, #tpu.memory_space<vmem>>, %arg2: memref<8x8xf32, #tpu.memory_space<vmem>>, %arg3: memref<24x64xbf16, #tpu.memory_space<vmem>>, %arg4: memref<8x64xbf16, #tpu.memory_space<vmem>>, %arg5: memref<64x64xbf16, #tpu.memory_space<vmem>>, %arg6: memref<64x2xbf16, #tpu.memory_space<vmem>>, %arg7: memref<3x64xf32, #tpu.memory_space<vmem>>, %arg8: memref<8x2xf32, #tpu.memory_space<vmem>>) attributes {dimension_semantics = [#tpu.dimension_semantics<parallel>], iteration_bounds = array<i64: 1>, scalar_prefetch = 0 : i64, scratch_operands = 0 : i64, tpu.core_type = #tpu.core_type<tc>, window_params = [{transform_indices = @transform_0, window_bounds = array<i64: 8, 24>}, {transform_indices = @transform_1, window_bounds = array<i64: 8, 8>}, {pipeline_mode = #tpu.pipeline_mode<synchronous>, transform_indices = @transform_2, window_bounds = array<i64: 24, 64>}, {pipeline_mode = #tpu.pipeline_mode<synchronous>, transform_indices = @transform_3, window_bounds = array<i64: 8, 64>}, {pipeline_mode = #tpu.pipeline_mode<synchronous>, transform_indices = @transform_4, window_bounds = array<i64: 64, 64>}, {pipeline_mode = #tpu.pipeline_mode<synchronous>, transform_indices = @transform_5, window_bounds = array<i64: 64, 2>}, {pipeline_mode = #tpu.pipeline_mode<synchronous>, transform_indices = @transform_6, window_bounds = array<i64: 3, 64>}, {transform_indices = @transform_7, window_bounds = array<i64: 8, 2>}]} {
    %c0 = arith.constant 0 : index
    %c0_0 = arith.constant 0 : index
    %0 = vector.load %arg3[%c0, %c0_0] : memref<24x64xbf16, #tpu.memory_space<vmem>>, vector<24x64xbf16>
    %c0_1 = arith.constant 0 : index
    %c0_2 = arith.constant 0 : index
    %1 = vector.load %arg4[%c0_1, %c0_2] : memref<8x64xbf16, #tpu.memory_space<vmem>>, vector<8x64xbf16>
    %c0_3 = arith.constant 0 : index
    %c0_4 = arith.constant 0 : index
    %2 = vector.load %arg5[%c0_3, %c0_4] : memref<64x64xbf16, #tpu.memory_space<vmem>>, vector<64x64xbf16>
    %c0_5 = arith.constant 0 : index
    %c0_6 = arith.constant 0 : index
    %3 = vector.load %arg6[%c0_5, %c0_6] : memref<64x2xbf16, #tpu.memory_space<vmem>>, vector<64x2xbf16>
    %c0_7 = arith.constant 0 : index
    %c0_8 = arith.constant 0 : index
    %4 = vector.load %arg1[%c0_7, %c0_8] : memref<8x24xf32, #tpu.memory_space<vmem>>, vector<8x24xf32>
    %5 = arith.truncf %4 : vector<8x24xf32> to vector<8x24xbf16>
    %c0_9 = arith.constant 0 : index
    %c0_10 = arith.constant 0 : index
    %6 = vector.load %arg2[%c0_9, %c0_10] : memref<8x8xf32, #tpu.memory_space<vmem>>, vector<8x8xf32>
    %7 = arith.truncf %6 : vector<8x8xf32> to vector<8x8xbf16>
    %cst = arith.constant dense<0.000000e+00> : vector<8x64xf32>
    %8 = tpu.matmul %5, %0, %cst {dimension_numbers = #tpu.dot_dimension_numbers<[1], [0], [0], [1], [0, 0, 1, 1], [], []>} : vector<8x24xbf16>, vector<24x64xbf16>, vector<8x64xf32> -> vector<8x64xf32>
    %cst_11 = arith.constant dense<0.000000e+00> : vector<8x64xf32>
    %9 = tpu.matmul %7, %1, %cst_11 {dimension_numbers = #tpu.dot_dimension_numbers<[1], [0], [0], [1], [0, 0, 1, 1], [], []>} : vector<8x8xbf16>, vector<8x64xbf16>, vector<8x64xf32> -> vector<8x64xf32>
    %10 = arith.addf %8, %9 : vector<8x64xf32>
    %c0_12 = arith.constant 0 : index
    %c0_13 = arith.constant 0 : index
    %11 = vector.load %arg7[%c0_12, %c0_13] : memref<3x64xf32, #tpu.memory_space<vmem>>, vector<1x64xf32>
    %12 = vector.broadcast %11 : vector<1x64xf32> to vector<8x64xf32>
    %13 = arith.addf %10, %12 : vector<8x64xf32>
    %cst_14 = arith.constant 0.000000e+00 : f32
    %14 = vector.broadcast %cst_14 : f32 to vector<8x64xf32>
    %15 = arith.maximumf %13, %14 : vector<8x64xf32>
    %16 = arith.truncf %15 : vector<8x64xf32> to vector<8x64xbf16>
    %cst_15 = arith.constant dense<0.000000e+00> : vector<8x64xf32>
    %17 = tpu.matmul %16, %2, %cst_15 {dimension_numbers = #tpu.dot_dimension_numbers<[1], [0], [0], [1], [0, 0, 1, 1], [], []>} : vector<8x64xbf16>, vector<64x64xbf16>, vector<8x64xf32> -> vector<8x64xf32>
    %c1 = arith.constant 1 : index
    %c0_16 = arith.constant 0 : index
    %18 = vector.load %arg7[%c1, %c0_16] : memref<3x64xf32, #tpu.memory_space<vmem>>, vector<1x64xf32>
    %19 = vector.broadcast %18 : vector<1x64xf32> to vector<8x64xf32>
    %20 = arith.addf %17, %19 : vector<8x64xf32>
    %cst_17 = arith.constant 0.000000e+00 : f32
    %21 = vector.broadcast %cst_17 : f32 to vector<8x64xf32>
    %22 = arith.maximumf %20, %21 : vector<8x64xf32>
    %c2 = arith.constant 2 : index
    %c0_18 = arith.constant 0 : index
    %23 = vector.load %arg7[%c2, %c0_18] : memref<3x64xf32, #tpu.memory_space<vmem>>, vector<1x64xf32>
    %24 = arith.truncf %22 : vector<8x64xf32> to vector<8x64xbf16>
    %cst_19 = arith.constant dense<0.000000e+00> : vector<8x2xf32>
    %25 = tpu.matmul %24, %3, %cst_19 {dimension_numbers = #tpu.dot_dimension_numbers<[1], [0], [0], [1], [0, 0, 1, 1], [], []>} : vector<8x64xbf16>, vector<64x2xbf16>, vector<8x2xf32> -> vector<8x2xf32>
    %26 = vector.extract_strided_slice %23 {offsets = [0, 0], sizes = [1, 2], strides = [1, 1]} : vector<1x64xf32> to vector<1x2xf32>
    %27 = vector.broadcast %26 : vector<1x2xf32> to vector<8x2xf32>
    %28 = arith.addf %25, %27 : vector<8x2xf32>
    %c0_20 = arith.constant 0 : index
    %c0_21 = arith.constant 0 : index
    %29 = vector.load %arg8[%c0_20, %c0_21] : memref<8x2xf32, #tpu.memory_space<vmem>>, vector<8x2xf32>
    tpu.vector_store %arg8[%c0_20, %c0_21], %28 {strides = array<i32>} : memref<8x2xf32, #tpu.memory_space<vmem>>, vector<8x2xf32>,
    return
  }
  func.func @transform_0(%arg0: i32) -> (i32, i32) {
    %c0_i32 = arith.constant 0 : i32
    %c0_i32_0 = arith.constant 0 : i32
    return %arg0, %c0_i32 : i32, i32
  }
  func.func @transform_1(%arg0: i32) -> (i32, i32) {
    %c0_i32 = arith.constant 0 : i32
    %c0_i32_0 = arith.constant 0 : i32
    return %arg0, %c0_i32 : i32, i32
  }
  func.func @transform_2(%arg0: i32) -> (i32, i32) {
    %c0_i32 = arith.constant 0 : i32
    %c0_i32_0 = arith.constant 0 : i32
    %c0_i32_1 = arith.constant 0 : i32
    return %c0_i32, %c0_i32_0 : i32, i32
  }
  func.func @transform_3(%arg0: i32) -> (i32, i32) {
    %c0_i32 = arith.constant 0 : i32
    %c0_i32_0 = arith.constant 0 : i32
    %c0_i32_1 = arith.constant 0 : i32
    return %c0_i32, %c0_i32_0 : i32, i32
  }
  func.func @transform_4(%arg0: i32) -> (i32, i32) {
    %c0_i32 = arith.constant 0 : i32
    %c0_i32_0 = arith.constant 0 : i32
    %c0_i32_1 = arith.constant 0 : i32
    return %c0_i32, %c0_i32_0 : i32, i32
  }
  func.func @transform_5(%arg0: i32) -> (i32, i32) {
    %c0_i32 = arith.constant 0 : i32
    %c0_i32_0 = arith.constant 0 : i32
    %c0_i32_1 = arith.constant 0 : i32
    return %c0_i32, %c0_i32_0 : i32, i32
  }
  func.func @transform_6(%arg0: i32) -> (i32, i32) {
    %c0_i32 = arith.constant 0 : i32
    %c0_i32_0 = arith.constant 0 : i32
    %c0_i32_1 = arith.constant 0 : i32
    return %c0_i32, %c0_i32_0 : i32, i32
  }
  func.func @transform_7(%arg0: i32) -> (i32, i32) {
    %c0_i32 = arith.constant 0 : i32
    %c0_i32_0 = arith.constant 0 : i32
    return %arg0, %c0_i32 : i32, i32
  }
}

</mosaic_0001>

<bundles_post_ra>
// kernel: qnetwork_forward.1
= control target key start
LH: loop header
LB: loop body
LE: loop exit
PB: predicated region body
PF: predicated region fallthrough
CT: control target
= control target key end

     0   :  { %12 = vsyncpa [#allocation3], 0  ;;  %s638_s0 = inlined_call_operand.vmem [shape: f32[8,24], index: 0, kind: input, shape index: {}]   ;;  %s639_s1 = inlined_call_operand.hbm [shape: f32[8,8], index: 1, kind: input, shape index: {}]   ;;  %s640_s2 = inlined_call_operand.hbm [shape: bf16[24,64], index: 2, kind: input, shape index: {}]   ;;  %s641_s3 = inlined_call_operand.hbm [shape: bf16[8,64], index: 3, kind: input, shape index: {}]   ;;  %s642_s4 = inlined_call_operand.vmem [shape: bf16[64,64], index: 4, kind: input, shape index: {}]   ;;  %s643_s5 = inlined_call_operand.vmem [shape: bf16[64,2], index: 5, kind: input, shape index: {}]   ;;  %s644_s6 = inlined_call_operand.hbm [shape: f32[3,64], index: 6, kind: input, shape index: {}]   ;;  %s645_s7 = inlined_call_operand.vmem [shape: f32[8,2], index: 7, kind: output, shape index: {}]  }
   0x1   :  { %13 = vsyncpa [#allocation5], 0 }
   0x2   :  { %14 = vsyncpa [#allocation8], 0  ;;  %s542_s24 = smov [#allocation4]  }
   0x3   :  { %s32_s25 = sshll.u32 %s542_s24, 4  ;;  %s33_s25 = int_to_ptr.vmem [resolvable:$true] %s32_s25 }
   0x4   :  { %s464_s26 = scalar_lea.vmem %s33_s25, 192  ;;  %p469_p1 = scmp.lt.s32.totalorder %s33_s25, %s33_s25 }
   0x5   :  { %p465_p0 = scmp.ne.s32.totalorder %s33_s25, %s464_s26  ;;  %p470_p2 = scmp.lt.s32.totalorder %s464_s26, %s464_s26 }
   0x7   :  { %p471_p3 = por %p470_p2, %p469_p1 }
   0x9   :  { %p472_p4 = pnand %p471_p3, %p465_p0 }
   0xb   :  { %475 = shalt.err (!%p472_p4)
}
   0xc   :  { %s543_s27 = smov 64   ;;  %s544_s28 = smov 4  }
   0xd   :  { %38 = dma.hbm_to_vmem [thread:$0]  %s640_s2, 192, %s33_s25, [#allocation5], %s543_s27, %s543_s27, %s544_s28  }
   0xe   :  { %s545_s8 = smov [#allocation2]   ;;  %s546_s10 = smov [#allocation6]  }
   0xf   :  { %s23_s9 = sshll.u32 %s545_s8, 4  ;;  %s45_s11 = sshll.u32 %s546_s10, 4  ;;  %s24_s9 = int_to_ptr.vmem [resolvable:$true] %s23_s9  ;;  %s46_s11 = int_to_ptr.vmem [resolvable:$true] %s45_s11 }
  0x10   :  { %s484_s12 = scalar_lea.vmem %s24_s9, 128  ;;  %p489_p6 = scmp.lt.s32.totalorder %s24_s9, %s24_s9 }
  0x11   :  { %p485_p5 = scmp.ne.s32.totalorder %s24_s9, %s484_s12  ;;  %p490_p7 = scmp.lt.s32.totalorder %s484_s12, %s484_s12 }
  0x13   :  { %p491_p8 = por %p490_p7, %p489_p6 }
  0x15   :  { %p492_p9 = pnand %p491_p8, %p485_p5 }
  0x17   :  { %495 = shalt.err (!%p492_p9)
}
  0x18   :  { %26 = dma.hbm_to_vmem [thread:$0]  %s639_s1, 128, %s24_s9, [#allocation3]  }
  0x19   :  { %s504_s15 = scalar_lea.vmem %s46_s11, 64  ;;  %p509_p11 = scmp.lt.s32.totalorder %s46_s11, %s46_s11 }
  0x1a   :  { %p505_p10 = scmp.ne.s32.totalorder %s46_s11, %s504_s15  ;;  %p510_p12 = scmp.lt.s32.totalorder %s504_s15, %s504_s15 }
  0x1c   :  { %p511_p13 = por %p510_p12, %p509_p11 }
  0x1e   :  { %p512_p0 = pnand %p511_p13, %p505_p10 }
  0x20   :  { %515 = shalt.err (!%p512_p0)
}
  0x21   :  { %48 = dma.hbm_to_vmem [thread:$0]  %s641_s3, 64, %s46_s11, [#allocation5]  }
  0x22   :  { %s547_s17 = smov [#allocation7]  }
  0x23   :  { %s59_s18 = sshll.u32 %s547_s17, 4  ;;  %s60_s18 = int_to_ptr.vmem [resolvable:$true] %s59_s18 }
  0x24   :  { %s524_s19 = scalar_lea.vmem %s60_s18, 64  ;;  %p529_p2 = scmp.lt.s32.totalorder %s60_s18, %s60_s18 }
  0x25   :  { %p525_p1 = scmp.ne.s32.totalorder %s60_s18, %s524_s19  ;;  %p530_p3 = scmp.lt.s32.totalorder %s524_s19, %s524_s19 }
  0x27   :  { %p531_p4 = por %p530_p3, %p529_p2 }
  0x29   :  { %p532_p5 = pnand %p531_p4, %p525_p1 }
  0x2b   :  { %535 = shalt.err (!%p532_p5)
}
  0x2c   :  { %62 = dma.hbm_to_vmem [thread:$0]  %s644_s6, 64, %s60_s18, [#allocation8]  }
  0x2d   :  { %536 = dma.done.wait [#allocation3], 128  }
  0x2e   :  { %537 = vsyncadd [#allocation3], 4294967168 }
  0x2f   :  { %538 = dma.done.wait [#allocation5], 256  }
  0x30   :  { %539 = vsyncadd [#allocation5], 4294967040 }
  0x31   :  { %540 = dma.done.wait [#allocation8], 64  }
  0x32   :  { %541 = vsyncadd [#allocation8], 4294967232  ;;  %v548_v0 = vmov 0.0   ;;  %vm549_vm0 = vmmov 0   ;;  %vm104_vm1 = vcmask 1043456   ;;  %vm100_vm2 = vcmask 64512  }
  0x33   :  { %400 = vmatprep.subr.bf16.mxu0 %v548_v0  ;;  %406 = vmatprep.subr.bf16.mxu1 %v548_v0  ;;  %v79_v1 = vld [vmem:[#allocation6] sm:$0xf]  ;;  %v446_v2 = vld [vmem:[#allocation4 + $0x8] ss:$0 sps:$4 sm:$0xff]   ;;  %v98_v4 = vld [vmem:[#allocation2] sm:$0xff]  ;;  %vm157_vm3 = vcmask 195584  }
  0x34   :  { %402 = vmatprep.mubr.msk.bf16.mxu0 %vm549_vm0, %v548_v0  ;;  %410 = vmatprep.mubr.msk.bf16.mxu1 %vm549_vm0, %v548_v0  ;;  %v106_v3 = vsel %vm104_vm1, %v79_v1, 0  ;;  %v162_v5 = vsel %vm104_vm1, %v446_v2, 0  ;;  %v99_v6 = vpack.c.bf16 %v98_v4, %v98_v4  ;;  %v447_v7 = vld [vmem:[#allocation4] sm:$0xff]   ;;  %v96_v8 = vld [vmem:[%s638_s0] sm:$0xff]  ;;  %v448_v10 = vld [vmem:[%s642_s4 + $0x18] sm:$0xff]   ;;  %vm241_vm4 = vcmask 523264  }
  0x35   :  { %401 = vmatpush3.bf16.msra.mxu0 %v106_v3  ;;  %407 = vmatpush3.bf16.msra.mxu1 %v162_v5  ;;  %v97_v9 = vpack.c.bf16 %v96_v8, %v96_v8  ;;  %v449_v11 = vld [vmem:[%s642_s4 + $0x10] sm:$0xff]   ;;  %v450_v12 = vld [vmem:[%s642_s4 + $0x8] sm:$0xff]   ;;  %v451_v13 = vld [vmem:[%s642_s4] sm:$0xff]   ;;  %vm359_vm5 = vcmask 15360  }
  0x36   :  { %414 = vmatprep.subr.bf16.mxu0 %v548_v0  ;;  %408 = vmatprep.subr.bf16.mxu1 %v548_v0  ;;  %v452_v14 = vld [vmem:[%s643_s5 + $0x18] sm:$0xff]   ;;  %v453_v15 = vld [vmem:[%s643_s5 + $0x10] sm:$0xff]   ;;  %v454_v29 = vld [vmem:[%s643_s5 + $0x8] sm:$0xff]  }
  0x37   :  { %v372_v20 = vld [vmem:[#allocation7] ss:$0 sm:$0xff]  ;;  %v455_v30 = vld [vmem:[%s643_s5] sm:$0xff]   ;;  %v373_v31 = vld [vmem:[#allocation7 + $0x1] ss:$0 sm:$0xff] }
  0x38   :  { %403 = vmatmul.mubr.msk.bf16.vlgmr.msra.gmra.mxu0 %vm100_vm2, %v99_v6  ;;  %v379_v39 = vld [vmem:[#allocation7 + $0x2] ss:$0 sm:$0xff] }
  0x39   :  { %422 = vmatprep.mubr.msk.bf16.mxu0 %vm549_vm0, %v548_v0  ;;  %409 = vmatpush3.bf16.msra.mxu1 %v447_v7 }
  0x3a   :  { %426 = vmatprep.subr.bf16.mxu1 %v548_v0  ;;  %415 = vmatpush3.bf16.msra.mxu0 %v448_v10 }
  0x3b   :  { %416 = vmatprep.subr.bf16.mxu0 %v548_v0 }
  0x3c   :  { %411 = vmatmul.mubr.msk.bf16.vlgmr.msra.gmra.mxu1 %vm157_vm3, %v97_v9 }
  0x3d   :  { %434 = vmatprep.mubr.msk.bf16.mxu1 %vm549_vm0, %v548_v0  ;;  %427 = vmatpush3.bf16.msra.mxu1 %v452_v14 }
  0x3e   :  { %417 = vmatpush3.bf16.msra.mxu0 %v449_v11  ;;  %428 = vmatprep.subr.bf16.mxu1 %v548_v0 }
  0x3f   :  { %418 = vmatprep.subr.bf16.mxu0 %v548_v0 }
  0x41   :  { %429 = vmatpush3.bf16.msra.mxu1 %v453_v15 }
  0x42   :  { %419 = vmatpush3.bf16.msra.mxu0 %v450_v12  ;;  %430 = vmatprep.subr.bf16.mxu1 %v548_v0 }
  0x43   :  { %420 = vmatprep.subr.bf16.mxu0 %v548_v0 }
  0x45   :  { %431 = vmatpush3.bf16.msra.mxu1 %v454_v29 }
  0x46   :  { %421 = vmatpush3.bf16.msra.mxu0 %v451_v13  ;;  %432 = vmatprep.subr.bf16.mxu1 %v548_v0 }
  0x49   :  { %433 = vmatpush3.bf16.msra.mxu1 %v455_v30 }
  0xf8   :  { %v142_v16 = vpop.f32.mrf.mxu0 }
  0xfa   :  { %v404_v17 = vpop.f32.mrf.mxu0 }
  0xfc   :  { %v145_v18 = vpop.f32.mrf.mxu0  ;;  %v198_v19 = vpop.f32.mrf.mxu1 }
  0xfd   :  { %v199_v22 = vadd.f32 %v198_v19, %v142_v16 }
  0xfe   :  { %v405_v21 = vpop.f32.mrf.mxu0  ;;  %v412_v23 = vpop.f32.mrf.mxu1 }
  0xff   :  { %v209_v24 = vadd.f32 %v372_v20, %v199_v22 }
 0x100   :  { %v201_v25 = vpop.f32.mrf.mxu1 }
 0x101   :  { %v210_v26 = vmax.f32 %v209_v24, 0.0 }
 0x102   :  { %v413_v27 = vpop.f32.mrf.mxu1 }
 0x103   :  { %v211_v28 = vpack.c.bf16 %v210_v26, %v210_v26 }
 0x105   :  { %423 = vmatmul.mubr.msk.bf16.vlgmr.msra.gmra.mxu0 %vm241_vm4, %v211_v28 }
 0x1c5   :  { %v279_v32 = vpop.f32.mrf.mxu0 }
 0x1c6   :  { %v280_v33 = vadd.f32 %v373_v31, %v279_v32 }
 0x1c7   :  { %v424_v34 = vpop.f32.mrf.mxu0 }
 0x1c8   :  { %v285_v35 = vmax.f32 %v280_v33, 0.0 }
 0x1c9   :  { %v282_v36 = vpop.f32.mrf.mxu0 }
 0x1ca   :  { %v287_v37 = vpack.c.bf16 %v285_v35, %v285_v35 }
 0x1cb   :  { %v425_v38 = vpop.f32.mrf.mxu0 }
 0x1cc   :  { %435 = vmatmul.mubr.msk.bf16.vlgmr.msra.gmra.mxu1 %vm241_vm4, %v287_v37 }
 0x28c   :  { %v353_v40 = vpop.f32.mrf.mxu1 }
 0x28d   :  { %v354_v41 = vadd.f32 %v379_v39, %v353_v40 }
 0x28e   :  { %v436_v42 = vpop.f32.mrf.mxu1 }
 0x28f   :  { %360 = vst.msk [vmem:[%s645_s7] sm:$0xff] %vm359_vm5, %v354_v41 }
 0x290   :  { %v356_v43 = vpop.f32.mrf.mxu1 }
 0x292   :  { %v437_v44 = vpop.f32.mrf.mxu1 }
 0x293   :  { %365 = vsyncpa [#allocation3], 1 }
 0x294   :  { %366 = vsyncpa [#allocation5], 1 }
 0x295   :  { %367 = vsyncpa [#allocation8], 1 }

</bundles_post_ra>
